<compile_context>
chip_gen: v7x
topology: tpu7x:2x2x1
jax: 0.10.0
libtpu: 0.0.40
codegen_flags: <defaults>
</compile_context>

<pallas_src>
import os
import functools

import jax
import jax.numpy as jnp
from jax import lax
from jax.experimental import pallas as pl
from jax.experimental.pallas import tpu as pltpu


def _round_up(x, m):
    return ((x + m - 1) // m) * m


# ---------------- Pallas kernel (fused linear + tanh + partial MSE) ----------------

def _fused_fwd_kernel(x_ref, w_ref, b_ref, o_ref, part_ref, *, m_valid):
    """o = tanh(x @ W + b); also emits per-tile, per-column sum(o*o) partials."""
    # MXU matmul with f32 accumulation; bias add + tanh in f32 (VPU/EUP).
    h = jnp.dot(x_ref[...], w_ref[...], preferred_element_type=jnp.float32)
    o = jnp.tanh(h + b_ref[...])                     # (tm, N_pad) f32
    o_ref[...] = o.astype(o_ref.dtype)

    # Fused MSE-metric partial reduction (saves a full HBM round trip of `o`
    # and a second pallas_call).  Mask rows past the true M so zero-padded
    # rows (whose value is tanh(b) != 0) don't leak into the loss.  Padded
    # *columns* are exactly zero (W/b zero-padded), so they need no mask.
    tm = o.shape[0]
    row = pl.program_id(0) * tm + lax.broadcasted_iota(jnp.int32, o.shape, 0)
    om = jnp.where(row < m_valid, o, 0.0)
    part_ref[...] = jnp.sum(om * om, axis=0, keepdims=True)   # (1, N_pad)


def fused_linear_tanh_mse(x2d, w, b, *, block_rows=512, operand_dtype=jnp.bfloat16):
    """Returns (tanh(x2d @ w + b) as [M, N] f32, scalar mean(o*o) f32)."""
    M, K = x2d.shape
    Kw, N = w.shape
    assert Kw == K, (Kw, K)

    # Lane-dense padding: last dims to multiples of 128, rows to the row tile.
    # Zero padding keeps both the matmul result and the loss exact.
    K_pad = _round_up(K, 128)
    N_pad = _round_up(N, 128)
    tm = _round_up(min(block_rows, _round_up(M, 8)), 8)
    M_pad = _round_up(M, tm)
    grid_m = M_pad // tm

    # bf16 operands at the pallas_call boundary; accumulation stays f32.
    x_p = jnp.zeros((M_pad, K_pad), operand_dtype).at[:M, :K].set(
        x2d.astype(operand_dtype))
    w_p = jnp.zeros((K_pad, N_pad), operand_dtype).at[:K, :N].set(
        w.astype(operand_dtype))
    b_p = jnp.zeros((1, N_pad), jnp.float32).at[:, :N].set(
        b.reshape(1, N).astype(jnp.float32))

    kernel = functools.partial(_fused_fwd_kernel, m_valid=M)

    itemsize = jnp.dtype(operand_dtype).itemsize
    cost = pl.CostEstimate(
        flops=2 * M_pad * K_pad * N_pad,
        transcendentals=M_pad * N_pad,
        bytes_accessed=((M_pad * K_pad + K_pad * N_pad) * itemsize
                        + (N_pad + M_pad * N_pad + grid_m * N_pad) * 4),
    )

    o_pad, partials = pl.pallas_call(
        kernel,
        out_shape=(
            jax.ShapeDtypeStruct((M_pad, N_pad), jnp.float32),
            jax.ShapeDtypeStruct((1, grid_m * N_pad), jnp.float32),
        ),
        grid=(grid_m,),
        in_specs=[
            pl.BlockSpec((tm, K_pad), lambda i: (i, 0)),      # x row tile (pipelined)
            pl.BlockSpec((K_pad, N_pad), lambda i: (0, 0)),   # W (resident)
            pl.BlockSpec((1, N_pad), lambda i: (0, 0)),       # b (resident)
        ],
        out_specs=(
            pl.BlockSpec((tm, N_pad), lambda i: (i, 0)),      # o row tile
            pl.BlockSpec((1, N_pad), lambda i: (0, i)),       # per-tile loss partials
        ),
        compiler_params=pltpu.CompilerParams(
            # Row tiles are independent -> both TensorCores on v7x megacore.
            dimension_semantics=("parallel",),
            # Tiles here are small; 32 MiB is safe on v5e (16 MiB default) and
            # within v6e/v7x defaults.
            vmem_limit_bytes=32 * 1024 * 1024,
        ),
        cost_estimate=cost,
    )(x_p, w_p, b_p)

    # Finalize outside the kernel: sum per-tile/per-column partials and scale by
    # a precomputed 1/n (true, unpadded element count).
    mean_sq = jnp.sum(partials) * (1.0 / float(M * N))
    return o_pad[:M, :N], mean_sq


# ---------------- Model wrapper (faithful dispatch semantics) ----------------

class SpaceModelBase:
    """Basic model wrapper (JAX/Pallas port of the PyTorch base class)."""

    _registry = dict()

    @classmethod
    def register(cls, name):
        SpaceModelBase._registry[name] = cls
        return

    @staticmethod
    def by_name(name):
        return SpaceModelBase._registry[name]

    @staticmethod
    def create(model_dir, config, *args, **kwargs):
        model_cls = SpaceModelBase.by_name(config["Model"]["model"])
        return model_cls(model_dir, config, *args, **kwargs)

    def __init__(self, model_dir, config):
        # Mirrors the torch __init__ bookkeeping (no parameters in the base class).
        self.init_checkpoint = os.path.join(model_dir, "pytorch_model.bin")
        self.abandon_label = config["Dataset"]["abandon_label"]
        self.use_gpu = config["use_gpu"]
        self.gpu = config["Trainer"]["gpu"]
        self.training = False

    # train()/eval() mode flags (no dropout/BN in the base class).
    def train(self):
        self.training = True

    def eval(self):
        self.training = False

    def _create_parameters(self):
        raise NotImplementedError

    def _forward(self, inputs, is_training, with_label):
        raise NotImplementedError

    def _collect_metrics(self, inputs, outputs, with_label, data_file):
        raise NotImplementedError

    def _optimize(self, loss, optimizer, lr_scheduler):
        raise NotImplementedError

    def _infer(self, inputs, start_id, eos_id, max_gen_len, prev_input):
        raise NotImplementedError

    def forward(self, inputs, is_training=False, with_label=False, data_file=None):
        if is_training:
            self.train()
        else:
            self.eval()
        with_label = False if self.abandon_label else with_label
        outputs = self._forward(inputs, is_training, with_label=with_label)
        metrics = self._collect_metrics(
            inputs, outputs, with_label=with_label, data_file=data_file)
        return metrics

    def infer(self, inputs, start_id=None, eos_id=None, max_gen_len=None, prev_input=None):
        self.eval()
        return self._infer(inputs, start_id=start_id, eos_id=eos_id,
                           max_gen_len=max_gen_len, prev_input=prev_input)


class _TinySpaceModel(SpaceModelBase):
    """Minimal concrete subclass so the base-class forward() dispatch runs end-to-end."""

    def __init__(self, model_dir, config, hidden=32, block_rows=8):
        super().__init__(model_dir, config)
        self.hidden = hidden
        # Small row tile for the demo so multiple grid steps are exercised;
        # production sizes would use the default 512.
        self.block_rows = block_rows
        self._create_parameters()

    def _create_parameters(self):
        key = jax.random.PRNGKey(0)
        kw, kb = jax.random.split(key)
        self.w = (jax.random.normal(kw, (self.hidden, self.hidden), jnp.float32)
                  * (1.0 / jnp.sqrt(self.hidden)))
        self.b = jax.random.normal(kb, (1, self.hidden), jnp.float32) * 0.02

    def _forward(self, inputs, is_training, with_label):
        x = inputs["src"]                              # [B, S, H]
        B, S, H = x.shape
        x2d = x.reshape(B * S, H)                      # glue reshape in plain JAX
        # Fused Pallas kernel: tanh(x @ W + b) and the mean-square metric in one pass
        # (metric fused here so the activations never make a second HBM round trip).
        hidden2d, mean_sq = fused_linear_tanh_mse(
            x2d, self.w, self.b, block_rows=self.block_rows)
        return {"hidden": hidden2d.reshape(B, S, H), "_mean_sq": mean_sq}

    def _collect_metrics(self, inputs, outputs, with_label, data_file):
        # Loss already reduced inside the fused kernel; just package it.
        return {"loss": outputs["_mean_sq"], "hidden": outputs["hidden"]}

    def _infer(self, inputs, start_id, eos_id, max_gen_len, prev_input):
        return self._forward(inputs, is_training=False, with_label=False)


_TinySpaceModel.register("tiny_space")


if __name__ == "__main__":
    config = {
        "Model": {"model": "tiny_space"},
        "Dataset": {"abandon_label": True},
        "Trainer": {"gpu": 0},
        "use_gpu": False,
    }
    model = SpaceModelBase.create("/tmp/space_model_dir", config)

    key = jax.random.PRNGKey(0)
    batch, seq, hidden = 2, 8, 32
    src = jax.random.normal(key, (batch, seq, hidden), jnp.float32)
    inputs = {"src": src}

    metrics = model.forward(inputs, is_training=False, with_label=True)
    jax.block_until_ready(metrics["loss"])
    jax.block_until_ready(metrics["hidden"])
    print("KERNEL_OK")
</pallas_src>

<mosaic_0001>
module attributes {stable_mosaic.version = 11 : i64} {
  func.func @_fused_fwd_kernel(%arg0: i32, %arg1: memref<8x128xbf16, #tpu.memory_space<vmem>>, %arg2: memref<128x128xbf16, #tpu.memory_space<vmem>>, %arg3: memref<1x128xf32, #tpu.memory_space<vmem>>, %arg4: memref<8x128xf32, #tpu.memory_space<vmem>>, %arg5: memref<1x128xf32, #tpu.memory_space<vmem>>) attributes {dimension_semantics = [#tpu.dimension_semantics<parallel>], iteration_bounds = array<i64: 2>, scalar_prefetch = 0 : i64, scratch_operands = 0 : i64, tpu.core_type = #tpu.core_type<tc>, window_params = [{transform_indices = @transform_0, window_bounds = array<i64: 8, 128>}, {pipeline_mode = #tpu.pipeline_mode<synchronous>, transform_indices = @transform_1, window_bounds = array<i64: 128, 128>}, {pipeline_mode = #tpu.pipeline_mode<synchronous>, transform_indices = @transform_2, window_bounds = array<i64: 1, 128>}, {transform_indices = @transform_3, window_bounds = array<i64: 8, 128>}, {transform_indices = @transform_4, window_bounds = array<i64: 1, 128>}]} {
    %c0 = arith.constant 0 : index
    %c0_0 = arith.constant 0 : index
    %0 = vector.load %arg1[%c0, %c0_0] : memref<8x128xbf16, #tpu.memory_space<vmem>>, vector<8x128xbf16>
    %c0_1 = arith.constant 0 : index
    %c0_2 = arith.constant 0 : index
    %1 = vector.load %arg2[%c0_1, %c0_2] : memref<128x128xbf16, #tpu.memory_space<vmem>>, vector<128x128xbf16>
    %cst = arith.constant dense<0.000000e+00> : vector<8x128xf32>
    %2 = tpu.matmul %0, %1, %cst {dimension_numbers = #tpu.dot_dimension_numbers<[1], [0], [0], [1], [0, 0, 1, 1], [], []>} : vector<8x128xbf16>, vector<128x128xbf16>, vector<8x128xf32> -> vector<8x128xf32>
    %c0_3 = arith.constant 0 : index
    %c0_4 = arith.constant 0 : index
    %3 = vector.load %arg3[%c0_3, %c0_4] : memref<1x128xf32, #tpu.memory_space<vmem>>, vector<1x128xf32>
    %4 = vector.broadcast %3 : vector<1x128xf32> to vector<8x128xf32>
    %5 = arith.addf %2, %4 : vector<8x128xf32>
    %6 = math.tanh %5 : vector<8x128xf32>
    %c0_5 = arith.constant 0 : index
    %c0_6 = arith.constant 0 : index
    %7 = vector.load %arg4[%c0_5, %c0_6] : memref<8x128xf32, #tpu.memory_space<vmem>>, vector<8x128xf32>
    tpu.vector_store %arg4[%c0_5, %c0_6], %6 {strides = array<i32>} : memref<8x128xf32, #tpu.memory_space<vmem>>, vector<8x128xf32>,
    %c8_i32 = arith.constant 8 : i32
    %8 = arith.muli %arg0, %c8_i32 : i32
    %9 = tpu.iota {dimensions = array<i32: 0>} : vector<8x128xi32>
    %10 = vector.broadcast %8 : i32 to vector<8x128xi32>
    %11 = arith.addi %10, %9 : vector<8x128xi32>
    %c16_i32 = arith.constant 16 : i32
    %12 = vector.broadcast %c16_i32 : i32 to vector<8x128xi32>
    %13 = arith.cmpi slt, %11, %12 : vector<8x128xi32>
    %cst_7 = arith.constant 0.000000e+00 : f32
    %14 = vector.broadcast %cst_7 : f32 to vector<8x128xf32>
    %15 = arith.select %13, %6, %14 : vector<8x128xi1>, vector<8x128xf32>
    %16 = arith.mulf %15, %15 : vector<8x128xf32>
    %cst_8 = arith.constant dense<0.000000e+00> : vector<128xf32>
    %17 = vector.multi_reduction <add>, %16, %cst_8 [0] : vector<8x128xf32> to vector<128xf32>
    %18 = vector.shape_cast %17 : vector<128xf32> to vector<1x128xf32>
    %c0_9 = arith.constant 0 : index
    %c0_10 = arith.constant 0 : index
    %19 = vector.load %arg5[%c0_9, %c0_10] : memref<1x128xf32, #tpu.memory_space<vmem>>, vector<1x128xf32>
    tpu.vector_store %arg5[%c0_9, %c0_10], %18 {strides = array<i32>} : memref<1x128xf32, #tpu.memory_space<vmem>>, vector<1x128xf32>,
    return
  }
  func.func @transform_0(%arg0: i32) -> (i32, i32) {
    %c0_i32 = arith.constant 0 : i32
    %c0_i32_0 = arith.constant 0 : i32
    return %arg0, %c0_i32 : i32, i32
  }
  func.func @transform_1(%arg0: i32) -> (i32, i32) {
    %c0_i32 = arith.constant 0 : i32
    %c0_i32_0 = arith.constant 0 : i32
    %c0_i32_1 = arith.constant 0 : i32
    return %c0_i32, %c0_i32_0 : i32, i32
  }
  func.func @transform_2(%arg0: i32) -> (i32, i32) {
    %c0_i32 = arith.constant 0 : i32
    %c0_i32_0 = arith.constant 0 : i32
    %c0_i32_1 = arith.constant 0 : i32
    return %c0_i32, %c0_i32_0 : i32, i32
  }
  func.func @transform_3(%arg0: i32) -> (i32, i32) {
    %c0_i32 = arith.constant 0 : i32
    %c0_i32_0 = arith.constant 0 : i32
    return %arg0, %c0_i32 : i32, i32
  }
  func.func @transform_4(%arg0: i32) -> (i32, i32) {
    %c0_i32 = arith.constant 0 : i32
    %c0_i32_0 = arith.constant 0 : i32
    return %c0_i32, %arg0 : i32, i32
  }
}

</mosaic_0001>

<bundles_post_ra>
// kernel: tpu_custom_call.1
= control target key start
LH: loop header
LB: loop body
LE: loop exit
PB: predicated region body
PF: predicated region fallthrough
CT: control target
= control target key end

     0   :  { %10 = vsyncpa [#allocation3], 0  ;;  %s1067_s0 = inlined_call_operand.hbm [shape: bf16[16,128], index: 0, kind: input, shape index: {}]   ;;  %s1068_s1 = inlined_call_operand.hbm [shape: bf16[128,128], index: 1, kind: input, shape index: {}]   ;;  %s1069_s2 = inlined_call_operand.vmem [shape: f32[1,128], index: 2, kind: input, shape index: {}]   ;;  %s1070_s3 = inlined_call_operand.hbm [shape: f32[16,128], index: 3, kind: output, shape index: {0}]   ;;  %s1071_s4 = inlined_call_operand.hbm [shape: f32[1,256], index: 4, kind: output, shape index: {1}]  }
   0x1   :  { %12 = vsyncpa [#allocation3 + $0x1], 0 }
   0x2   :  { %13 = vsyncpa [#allocation6], 0 }
   0x3   :  { %14 = vsyncpa [#allocation4], 0 }
   0x4   :  { %16 = vsyncpa [#allocation4 + $0x1], 0 }
   0x5   :  { %17 = vsyncpa [#allocation9], 0 }
   0x6   :  { %19 = vsyncpa [#allocation9 + $0x1], 0  ;;  %s832_s15 = smov 0   ;;  %s834_s16 = smov 0  }
   0x7   :  { %s836_s17 = smov 0   ;;  %s838_s18 = smov 0  }
   0x8 LB: > { %s853_s19 = sadd.s32 4294967295, %s797_s18   ;;  %s507_s20 = sadd.s32 4294967294, %s797_s18   ;;  %s797_s18 = sphi %s838_s18, %s1091_s18   ;;  %s793_s17 = sphi %s836_s17, %s1090_s17   ;;  %s789_s16 = sphi %s834_s16, %s1089_s16   ;;  %s785_s15 = sphi %s832_s15, %s1088_s15  }
   0x9   : > { %p45_p0 = scmp.ne.s32.totalorder %s789_s16, %s785_s15  ;;  %p1072_p1 = scmp.eq.s32.totalorder %s853_s19, 0 }
   0xa   : > { %p117_p3 = scmp.eq.s32.totalorder %s507_s20, 1  ;;  %p508_p5 = scmp.ge.s32.totalorder %s797_s18, 1 }
   0xb   : > { %p862_p4 = por %p1072_p1, %p45_p0  ;;  %p150_p7 = scmp.lt.s32.totalorder %s797_s18, 3 }
   0xc   : > { %p867_p6 = por %p117_p3, %p45_p0  ;;  %s799_s24 = smov [#allocation5]  }
   0xd   : > { %s1075_s21 = scalar_select %p862_p4, 1, 0 }
   0xe   : > { %s1076_s22 = scalar_select %p867_p6, 1, 0 }
   0xf   : > { %p872_p8 = pnand %p508_p5, %p150_p7  ;;  %s162_s25 = sshll.u32 %s799_s24, 4  ;;  %s876_s25 = int_to_ptr.vmem [resolvable:$true] %s162_s25 }
  0x10   : > { %s888_s27 = sadd.s32 1, %s797_s18   ;;  %s32_s28 = sadd.s32 1, %s793_s17 }
  0x11   : > { %s1077_s23 = scalar_select %p872_p8, 1, 0 }
  0x12   : > { %p571_p9 = pneg %p872_p8  ;;  %s29_s29 = ssub.s32 %s797_s18, %s888_s27 }
  0x13   : > { %s637_s6 = scalar_lea.hbm %s1068_s1, 1024 }
  0x14   : > { %p883_p11 = pnand %p571_p9, %p1072_p1  ;;  %p638_p12 = scmp.ne.s32.totalorder %s1068_s1, %s637_s6 }
  0x15   : > { %p644_p5 = scmp.lt.u32.totalorder %s637_s6, %s1068_s1 }
  0x16   : > { %p639_p13 = pneg %p883_p11 }
  0x18   : > { %p640_p0 = pnand %p639_p13, %p638_p12 }
  0x1a   : > { %p641_p3 = pneg %p640_p0 }
  0x1c   : > { %p646_p7 = pnand %p644_p5, %p641_p3 }
  0x1e   : > { %649 = shalt.err (!%p646_p7)
}
  0x1f   : > { %s650_s11 = scalar_lea.vmem %s876_s25, 1024  ;;  %p658_p2 = scmp.lt.s32.totalorder %s876_s25, %s876_s25 }
  0x20   : > { %p651_p9 = scmp.ne.s32.totalorder %s876_s25, %s650_s11  ;;  %p659_p6 = scmp.lt.s32.totalorder %s650_s11, %s650_s11 }
  0x22   : > { %p653_p10 = pnand %p651_p9, %p639_p13  ;;  %p660_p4 = por %p659_p6, %p658_p2 }
  0x24   : > { %p654_p1 = pneg %p653_p10 }
  0x26   : > { %p661_p8 = pnand %p660_p4, %p654_p1 }
  0x28   : > { %664 = shalt.err (!%p661_p8)
}
  0x29   : > { %s800_s12 = smov 64   ;;  %s801_s13 = smov 4  }
  0x2a   : > { %574 = dma.hbm_to_vmem [thread:$0]  (!%p883_p11), %s1068_s1, 1024, %s876_s25, [#allocation6], %s800_s12, %s800_s12, %s801_s13  }
  0x2b   : > { %p30_p2 = scmp.eq.s32.totalorder %s29_s29, 0  ;;  %p39_p1 = scmp.ne.s32.totalorder %s793_s17, %s789_s16 }
  0x2c   : > { %p40_p4 = scmp.eq.s32.totalorder %s797_s18, 0  ;;  %p587_p6 = scmp.lt.s32.totalorder %s797_s18, 2 }
  0x2d   : > { %s919_s24 = scalar_select %p30_p2, %s793_s17, %s32_s28  }
  0x2e   : > { %p41_p8 = por %p40_p4, %p39_p1  ;;  %p1079_p10 = scmp.eq.s32.totalorder %s853_s19, 1 }
  0x2f   : > { %s179_s5 = sand.u32 1, %s793_s17   ;;  %s512_s6 = sshll.u32 %s797_s18, 6 }
  0x30   : > { %p923_p12 = por %p1079_p10, %p39_p1  ;;  %s511_s7 = sshll.u32 %s179_s5, 2 }
  0x31   : > { %s932_s9 = scalar_lea.hbm %s1067_s0, %s512_s6  ;;  %s183_s25 = scalar_lea.vmem [#allocation2], %s511_s7 }
  0x32   : > { %s190_s28 = sshll.u32 %s183_s25, 4  ;;  %p934_p11 = pnand %p587_p6, %p41_p8  ;;  %s938_s28 = int_to_ptr.vmem [resolvable:$true] %s190_s28 }
  0x33   : > { %s180_s10 = scalar_lea.sflag [#allocation3], %s179_s5  ;;  %s665_s11 = scalar_lea.hbm %s932_s9, 64 }
  0x34   : > { %p666_p13 = scmp.ne.s32.totalorder %s932_s9, %s665_s11  ;;  %p667_p0 = pneg %p934_p11 }
  0x35   : > { %s670_s14 = scalar_lea.hbm %s1067_s0, 128  ;;  %p671_p7 = scmp.lt.u32.totalorder %s932_s9, %s1067_s0 }
  0x36   : > { %p668_p3 = pnand %p667_p0, %p666_p13  ;;  %p672_p9 = scmp.lt.u32.totalorder %s670_s14, %s665_s11 }
  0x37   : > { %p674_p1 = scmp.lt.u32.totalorder %s665_s11, %s932_s9 }
  0x38   : > { %p669_p5 = pneg %p668_p3  ;;  %p673_p2 = por %p672_p9, %p671_p7 }
  0x3a   : > { %p675_p4 = por %p674_p1, %p673_p2 }
  0x3c   : > { %p676_p6 = pnand %p675_p4, %p669_p5 }
  0x3e   : > { %679 = shalt.err (!%p676_p6)
}
  0x3f   : > { %s680_s5 = scalar_lea.vmem %s938_s28, 64  ;;  %s802_s7 = smov [#allocation2]  }
  0x40   : > { %p681_p8 = scmp.ne.s32.totalorder %s938_s28, %s680_s5  ;;  %s685_s26 = sshll.u32 %s802_s7, 4  ;;  %s686_s26 = int_to_ptr.vmem [resolvable:$false] %s685_s26 }
  0x41   : > { %s687_s8 = scalar_lea.vmem %s686_s26, 128  ;;  %p688_p3 = scmp.lt.s32.totalorder %s938_s28, %s686_s26 }
  0x42   : > { %p683_p10 = pnand %p681_p8, %p667_p0  ;;  %p689_p7 = scmp.lt.s32.totalorder %s687_s8, %s680_s5 }
  0x44   : > { %p684_p13 = pneg %p683_p10  ;;  %p690_p9 = por %p689_p7, %p688_p3 }
  0x46   : > { %p691_p2 = pnand %p690_p9, %p684_p13 }
  0x48   : > { %694 = shalt.err (!%p691_p2)
}
  0x49   : > { %578 = dma.hbm_to_vmem [thread:$0]  (!%p934_p11), %s932_s9, 64, %s938_s28, %s180_s10  }
  0x4a   : > { %p1082_p5 = scmp.ne.s32.totalorder %s1077_s23, 0 }
  0x4b   : > { %s968_s25 = sand.u32 (!%p1082_p5), 1, %s789_s16   ;;  %p1083_p0 = scmp.ne.s32.totalorder (!%p1082_p5), %s1075_s21, 0 }
  0x4c   : > { %199 = sbr.rel (%p1082_p5) target bundleno = 385 (0x181), region = 32  ;;  %s514_s11 = sshll.u32 (!%p1082_p5), %s968_s25, 2 }
  0x4d   : > { %s202_s12 = scalar_lea.sflag (!%p1082_p5), [#allocation3], %s968_s25  ;;  %s972_s13 = scalar_lea.vmem (!%p1082_p5), [#allocation2], %s514_s11 }
  0x53   : > { %768 = dma.done.wait (%p1083_p0), %s202_s12, 64  }
  0x54   : > { %770 = vsyncadd (%p1083_p0), %s202_s12, 4294967232  ;;  %p1084_p11 = scmp.eq.s32.totalorder %s853_s19, 0 }
  0x56   : > { %772 = dma.done.wait (%p1084_p11), [#allocation6], 1024   ;;  %p1085_p1 = pmov %p1084_p11 }
  0x57   : > { %v803_v0 = vmov 0.0   ;;  %vm804_vm0 = vmmov 0   ;;  %v627_v1 = vld [vmem:[#allocation5] sm:$0xff]   ;;  %v628_v2 = vld [vmem:[#allocation5 + $0x8] sm:$0xff]   ;;  %v629_v3 = vld [vmem:[#allocation5 + $0x10] sm:$0xff]   ;;  %v354_v11 = vlaneseq  ;;  %s526_s9 = sshll.u32 %s853_s19, 3 }
  0x58   : > { %774 = vsyncadd (%p1085_p1), [#allocation6], 4294966272  ;;  %541 = vmatprep.subr.bf16.mxu0 %v803_v0  ;;  %557 = vmatprep.mubr.msk.bf16.mxu0 %vm804_vm0, %v803_v0  ;;  %v630_v4 = vld [vmem:[#allocation5 + $0x18] sm:$0xff]   ;;  %v631_v5 = vld [vmem:[#allocation5 + $0x20] sm:$0xff]   ;;  %v356_v18 = vstv %s526_s9  ;;  %s516_s28 = sshll.u32 %s968_s25, 3  ;;  %s528_s29 = sshll.u32 %s853_s19, 7 }
  0x59   : > { %542 = vmatpush3.bf16.msra.mxu0 %v627_v1  ;;  %v632_v6 = vld [vmem:[#allocation5 + $0x28] sm:$0xff]   ;;  %v633_v7 = vld [vmem:[#allocation5 + $0x30] sm:$0xff]   ;;  %v634_v8 = vld [vmem:[#allocation5 + $0x38] sm:$0xff]   ;;  %v355_v16 = vshrl.u32 %v354_v11, 7  ;;  %s231_s10 = scalar_lea.vmem [#allocation7], %s516_s28  ;;  %s992_s5 = scalar_lea.hbm %s1070_s3, %s528_s29 }
  0x5a   : > { %543 = vmatprep.subr.bf16.mxu0 %v803_v0  ;;  %v239_v9 = vld [vmem:[%s972_s13] sm:$0xf]  ;;  %s386_s14 = sshll.u32 %s231_s10, 4  ;;  %s369_s7 = scalar_lea.sflag [#allocation4], %s968_s25  ;;  %s994_s14 = int_to_ptr.vmem [resolvable:$true] %s386_s14 }
  0x5b   : > { %v517_v10 = vld [vmem:[%s1069_s2] ss:$0 sm:$0xff]  ;;  %v357_v19 = vadd.s32 %v356_v18, %v355_v16  ;;  %s695_s26 = scalar_lea.vmem %s994_s14, 128  ;;  %s805_s8 = smov [#allocation7]  }
  0x5c   : > { %p696_p4 = scmp.ne.s32.totalorder %s994_s14, %s695_s26  ;;  %s699_s11 = sshll.u32 %s805_s8, 4  ;;  %s700_s11 = int_to_ptr.vmem [resolvable:$false] %s699_s11 }
  0x5d   : > { %544 = vmatpush3.bf16.msra.mxu0 %v628_v2  ;;  %vm358_vm1 = vcmp.lt.s32.totalorder %v357_v19, 16  ;;  %s701_s12 = scalar_lea.vmem %s700_s11, 256  ;;  %p702_p10 = scmp.lt.s32.totalorder %s994_s14, %s700_s11 }
  0x5e   : > { %545 = vmatprep.subr.bf16.mxu0 %v803_v0  ;;  %p697_p6 = pnand %p696_p4, %p923_p12  ;;  %p703_p13 = scmp.lt.s32.totalorder %s701_s12, %s695_s26 }
  0x60   : > { %p698_p8 = pneg %p697_p6  ;;  %p704_p3 = por %p703_p13, %p702_p10 }
  0x61   : > { %546 = vmatpush3.bf16.msra.mxu0 %v629_v3 }
  0x62   : > { %547 = vmatprep.subr.bf16.mxu0 %v803_v0  ;;  %p705_p7 = pnand %p704_p3, %p698_p8 }
  0x65   : > { %548 = vmatpush3.bf16.msra.mxu0 %v630_v4 }
  0x66   : > { %549 = vmatprep.subr.bf16.mxu0 %v803_v0 }
  0x69   : > { %550 = vmatpush3.bf16.msra.mxu0 %v631_v5 }
  0x6a   : > { %551 = vmatprep.subr.bf16.mxu0 %v803_v0 }
  0x6d   : > { %552 = vmatpush3.bf16.msra.mxu0 %v632_v6 }
  0x6e   : > { %553 = vmatprep.subr.bf16.mxu0 %v803_v0 }
  0x71   : > { %554 = vmatpush3.bf16.msra.mxu0 %v633_v7 }
  0x72   : > { %555 = vmatprep.subr.bf16.mxu0 %v803_v0 }
  0x75   : > { %556 = vmatpush3.bf16.msra.mxu0 %v634_v8 }
  0x78   : > { %558 = vmatmul.mubr.bf16.vlgmr.msra.gmra.mrb[0].mxu0 %v239_v9 }
 0x14b   : > { %v345_v12 = vpop.f32.mrb[0].mxu0 }
 0x14c   : > { %v346_v13 = vadd.f32 %v517_v10, %v345_v12  ;;  %v559_v14 = vpop.f32.mrb[1].mxu0 }
 0x14d   : > { %v348_v15 = vpop.f32.mrb[2].mxu0 }
 0x14e   : > { %635 = vtanh.f32 %v346_v13  ;;  %v560_v17 = vpop.f32.mrb[3].mxu0 }
 0x158   : > { %v636_v20 = vpop.eup %635 }
 0x159   : > { %v359_v21 = vsel %vm358_vm1, %v636_v20, 0.0  ;;  %352 = vst [vmem:[%s231_s10] sm:$0xff] %v636_v20 }
 0x15a   : > { %v360_v22 = vmul.f32 %v359_v21, %v359_v21 }
 0x15b   : > { %708 = shalt.err (!%p705_p7)
}
 0x15c   : > { %s709_s13 = scalar_lea.hbm %s992_s5, 128  ;;  %s713_s9 = scalar_lea.hbm %s1070_s3, 256 }
 0x15d   : > { %p710_p9 = scmp.ne.s32.totalorder %s992_s5, %s709_s13  ;;  %p714_p0 = scmp.lt.u32.totalorder %s992_s5, %s1070_s3 }
 0x15e   : > { %p715_p11 = scmp.lt.u32.totalorder %s713_s9, %s709_s13  ;;  %p717_p4 = scmp.lt.u32.totalorder %s709_s13, %s992_s5 }
 0x15f   : > { %p711_p2 = pnand %p710_p9, %p923_p12 }
 0x160   : > { %p716_p1 = por %p715_p11, %p714_p0 }
 0x161   : > { %p712_p5 = pneg %p711_p2 }
 0x162   : > { %p718_p6 = por %p717_p4, %p716_p1 }
 0x164   : > { %p719_p8 = pnand %p718_p6, %p712_p5 }
 0x166   : > { %722 = shalt.err (!%p719_p8)
}
 0x167   : > { %567 = dma.vmem_to_hbm [thread:$0]  (%p923_p12), %s994_s14, 128, %s992_s5, %s369_s7   ;;  %v361_v23 = vrot.slane %v360_v22, 4 }
 0x168   : > { %s529_s10 = sshll.u32 %s853_s19, 4  ;;  %s237_s20 = scalar_lea.vmem [#allocation8], %s968_s25 }
 0x169   : > { %v362_v24 = vadd.f32 %v361_v23, %v360_v22  ;;  %s399_s6 = sshll.u32 %s237_s20, 4  ;;  %s1023_s11 = scalar_lea.hbm %s1071_s4, %s529_s10  ;;  %s1025_s6 = int_to_ptr.vmem [resolvable:$true] %s399_s6 }
 0x16a   : > { %s374_s14 = scalar_lea.sflag [#allocation9], %s968_s25  ;;  %s723_s5 = scalar_lea.vmem %s1025_s6, 16 }
 0x16b   : > { %v363_v25 = vrot.slane %v362_v24, 2  ;;  %p724_p10 = scmp.ne.s32.totalorder %s1025_s6, %s723_s5  ;;  %s806_s19 = smov [#allocation8]  }
 0x16c   : > { %s727_s7 = sshll.u32 %s806_s19, 4  ;;  %s728_s7 = int_to_ptr.vmem [resolvable:$false] %s727_s7 }
 0x16d   : > { %v364_v26 = vadd.f32 %v363_v25, %v362_v24  ;;  %p725_p13 = pnand %p724_p10, %p923_p12  ;;  %s729_s12 = scalar_lea.vmem %s728_s7, 32 }
 0x16e   : > { %p730_p7 = scmp.lt.s32.totalorder %s1025_s6, %s728_s7  ;;  %p731_p9 = scmp.lt.s32.totalorder %s729_s12, %s723_s5 }
 0x16f   : > { %v365_v27 = vrot.slane %v364_v26, 1  ;;  %p726_p3 = pneg %p725_p13 }
 0x170   : > { %p732_p2 = por %p731_p9, %p730_p7 }
 0x171   : > { %v366_v28 = vadd.f32 %v365_v27, %v364_v26 }
 0x172   : > { %p733_p5 = pnand %p732_p2, %p726_p3 }
 0x173   : > { %367 = vst [vmem:[%s237_s20] sm:$0x1] %v366_v28 }
 0x174   : > { %736 = shalt.err (!%p733_p5)
}
 0x175   : > { %s737_s25 = scalar_lea.hbm %s1023_s11, 16  ;;  %s741_s23 = scalar_lea.hbm %s1071_s4, 32 }
 0x176   : > { %p738_p0 = scmp.ne.s32.totalorder %s1023_s11, %s737_s25  ;;  %p742_p4 = scmp.lt.u32.totalorder %s1023_s11, %s1071_s4 }
 0x177   : > { %p743_p6 = scmp.lt.u32.totalorder %s741_s23, %s737_s25  ;;  %p745_p10 = scmp.lt.u32.totalorder %s737_s25, %s1023_s11 }
 0x178   : > { %p739_p11 = pnand %p738_p0, %p923_p12 }
 0x179   : > { %p744_p8 = por %p743_p6, %p742_p4 }
 0x17a   : > { %p740_p1 = pneg %p739_p11 }
 0x17b   : > { %p746_p13 = por %p745_p10, %p744_p8 }
 0x17d   : > { %p747_p3 = pnand %p746_p13, %p740_p1 }
 0x17f   : > { %750 = shalt.err (!%p747_p3)
}
 0x180   : > { %568 = dma.vmem_to_hbm [thread:$0]  (%p923_p12), %s1025_s6, 16, %s1023_s11, %s374_s14  }
 0x181 PF: > { %s411_s29 = sand.u32 1, %s785_s15   ;;  %p1086_p7 = scmp.ne.s32.totalorder %s1076_s22, 0 }
 0x182   : > { %p1087_p9 = scmp.ge.s32.totalorder %s797_s18, 2  ;;  %s412_s10 = scalar_lea.sflag [#allocation4], %s411_s29 }
 0x184   : > { %p580_p2 = pnand %p1087_p9, %p1086_p7 }
 0x186   : > { %776 = dma.done.wait (!%p580_p2), %s412_s10, 128  }
 0x187   : > { %778 = vsyncadd (!%p580_p2), %s412_s10, 4294967168  ;;  %s421_s20 = scalar_lea.sflag [#allocation9], %s411_s29 }
 0x188   : > { %780 = dma.done.wait (!%p580_p2), %s421_s20, 16  }
 0x189   : > { %782 = vsyncadd (!%p580_p2), %s421_s20, 4294967280  ;;  %p22_p12 = scmp.ge.s32.totalorder %s888_s27, 4   ;;  %s1088_s15 = smov %s789_s16 }
 0x18a   : > { %s1089_s16 = smov %s793_s17  ;;  %s1090_s17 = smov %s919_s24 }
 0x18b   : > { %s1091_s18 = smov %s888_s27  ;;  %24 = sbr.rel (!%p22_p12) target bundleno = 8 (0x8), region = 98 }
 0x192   :  { %425 = vsyncpa [#allocation3], 1 }
 0x193   :  { %427 = vsyncpa [#allocation3 + $0x1], 1 }
 0x194   :  { %428 = vsyncpa [#allocation6], 1 }
 0x195   :  { %429 = vsyncpa [#allocation4], 1 }
 0x196   :  { %431 = vsyncpa [#allocation4 + $0x1], 1 }
 0x197   :  { %432 = vsyncpa [#allocation9], 1 }
 0x198   :  { %434 = vsyncpa [#allocation9 + $0x1], 1 }

</bundles_post_ra>
